<compile_context>
chip_gen: v6e
topology: v6e:2x2x1
jax: 0.10.0
libtpu: 0.0.40
codegen_flags: <defaults>
</compile_context>

<pallas_src>
import jax
import jax.numpy as jnp
from jax.experimental import pallas as pl
from jax.experimental.pallas import tpu as pltpu


# ----------------------------------------------------------------------------- kernels
def _se_kernel_chw(x_ref, w1t_ref, w2_ref, o_ref):
    # x_ref  : (1, C, HW)  channels on sublanes, spatial on lanes
    # w1t_ref: (C, Cr)     fc1.weight transposed  (fc1.weight is (Cr, C))
    # w2_ref : (C, Cr)     fc2.weight
    x = x_ref[0]                                                   # (C, HW) storage dtype
    # Squeeze: f32 accumulation, cast folded into the reduction (no f32 slab copy).
    pooled = jnp.mean(x.astype(jnp.float32), axis=-1, keepdims=True)   # (C, 1)

    # Excite: tiny FC path on VPU broadcast-mul + XLU reductions (avoids 1-wide MXU).
    w1t = w1t_ref[...].astype(jnp.float32)                         # (C, Cr)
    h = jnp.maximum(jnp.sum(w1t * pooled, axis=0, keepdims=True), 0.0)   # (1, Cr)
    w2 = w2_ref[...].astype(jnp.float32)                           # (C, Cr)
    z = jnp.sum(w2 * h, axis=-1, keepdims=True)                    # (C, 1)
    s = 1.0 / (1.0 + jnp.exp(-z))                                  # sigmoid via EUP exp

    # Rescale in the storage dtype (bf16 native on v6e/v7x); gate broadcasts over lanes.
    o_ref[0] = (x * s.astype(x.dtype)).astype(o_ref.dtype)


def _se_kernel_hwc(x_ref, w1_ref, w2t_ref, o_ref):
    # x_ref  : (1, HW, C)  spatial on sublanes, channels on lanes (lane-dense for C % 128 == 0)
    # w1_ref : (Cr, C)     fc1.weight
    # w2t_ref: (Cr, C)     fc2.weight transposed
    x = x_ref[0]                                                   # (HW, C)
    pooled = jnp.mean(x.astype(jnp.float32), axis=0, keepdims=True)      # (1, C)

    w1 = w1_ref[...].astype(jnp.float32)                           # (Cr, C)
    h = jnp.maximum(jnp.sum(w1 * pooled, axis=-1, keepdims=True), 0.0)   # (Cr, 1)
    w2t = w2t_ref[...].astype(jnp.float32)                         # (Cr, C)
    z = jnp.sum(w2t * h, axis=0, keepdims=True)                    # (1, C)
    s = 1.0 / (1.0 + jnp.exp(-z))

    # Gate broadcasts over sublanes; multiply in the storage dtype.
    o_ref[0] = (x * s.astype(x.dtype)).astype(o_ref.dtype)


# ----------------------------------------------------------------------------- wrapper
def _vmem_capacity_bytes():
    """Physical VMEM of the current generation; conservative fallback = v7x per-TC."""
    try:
        info = pltpu.get_tpu_info()
        cap = getattr(info, "vmem_capacity_bytes", None)
        if cap:
            return int(cap)
    except Exception:
        pass
    return 64 * 1024 * 1024


def _lane_util(d):
    """Fraction of the 128-wide lane dim actually used when d sits on lanes."""
    return d / (128.0 * (-(-d // 128)))


def se_layer(x, fc1_weight, fc2_weight):
    """SELayer forward.  x: (B, C, H, W); fc1_weight: (C//r, C); fc2_weight: (C, C//r)."""
    B, C, H, W = x.shape
    Cr = fc1_weight.shape[0]
    assert fc1_weight.shape == (Cr, C) and fc2_weight.shape == (C, Cr)
    HW = H * W

    # Generation-aware scoped-VMEM budget: ~75% of physical VMEM, capped at 96 MiB
    # (v5e/v6e: 128 MiB physical -> 96 MiB limit; v7x: 64 MiB -> 48 MiB limit).
    vmem_cap = _vmem_capacity_bytes()
    vmem_limit = min(int(0.75 * vmem_cap), 96 * 1024 * 1024)

    bytes_per_slab = C * HW * x.dtype.itemsize
    weight_bytes = 2 * C * Cr * max(fc1_weight.dtype.itemsize, fc2_weight.dtype.itemsize)
    # 2x-in + 2x-out double buffers + weight buffers + headroom for Mosaic scratch.
    assert 4 * bytes_per_slab + 2 * weight_bytes + (2 << 20) <= vmem_limit, (
        "per-batch slab too large for the fused single-pass SE kernel")
    # TODO(synk): add a spatially tiled two-pass (pool kernel + scale kernel)
    # fallback for slabs that exceed the fused-path VMEM budget.

    cost = pl.CostEstimate(
        flops=3 * B * C * HW + 4 * B * C * Cr,
        transcendentals=B * C,
        bytes_accessed=2 * B * C * HW * x.dtype.itemsize + weight_bytes,
    )
    cparams = pltpu.CompilerParams(
        # Batch steps are independent -> shard across TensorCores (v7x megacore).
        # NOTE: with B == 1 at inference the second v7x core idles; batch callers.
        dimension_semantics=("parallel",),
        vmem_limit_bytes=vmem_limit,
    )

    # Layout choice: spatial-on-lanes unless channels are strictly more lane-dense
    # (covers the common 7x7 / 14x14 SE shapes, where C is a multiple of 128).
    use_chw = _lane_util(HW) >= _lane_util(C)

    if use_chw:
        x3 = x.reshape(B, C, HW)                        # free reshape (contiguous merge)
        w1t = jnp.transpose(fc1_weight)                 # (C, Cr), tiny
        out3 = pl.pallas_call(
            _se_kernel_chw,
            out_shape=jax.ShapeDtypeStruct((B, C, HW), x.dtype),
            grid_spec=pltpu.PrefetchScalarGridSpec(
                num_scalar_prefetch=0,
                grid=(B,),
                in_specs=[
                    pl.BlockSpec((1, C, HW), lambda b: (b, 0, 0)),
                    # Constant block index -> weights DMA'd once, stay VMEM-resident.
                    pl.BlockSpec((C, Cr), lambda b: (0, 0)),
                    pl.BlockSpec((C, Cr), lambda b: (0, 0)),
                ],
                out_specs=pl.BlockSpec((1, C, HW), lambda b: (b, 0, 0)),
            ),
            compiler_params=cparams,
            cost_estimate=cost,
        )(x3, w1t, fc2_weight)
        return out3.reshape(B, C, H, W)

    # Channels-on-lanes path.  With a PyTorch NCHW input this costs a wrapper
    # transpose (layout plumbing); in an NHWC-native model it would be free.
    x3 = jnp.transpose(x.reshape(B, C, HW), (0, 2, 1))  # (B, HW, C)
    w2t = jnp.transpose(fc2_weight)                     # (Cr, C), tiny
    out3 = pl.pallas_call(
        _se_kernel_hwc,
        out_shape=jax.ShapeDtypeStruct((B, HW, C), x.dtype),
        grid_spec=pltpu.PrefetchScalarGridSpec(
            num_scalar_prefetch=0,
            grid=(B,),
            in_specs=[
                pl.BlockSpec((1, HW, C), lambda b: (b, 0, 0)),
                pl.BlockSpec((Cr, C), lambda b: (0, 0)),
                pl.BlockSpec((Cr, C), lambda b: (0, 0)),
            ],
            out_specs=pl.BlockSpec((1, HW, C), lambda b: (b, 0, 0)),
        ),
        compiler_params=cparams,
        cost_estimate=cost,
    )(x3, fc1_weight, w2t)
    return jnp.transpose(out3, (0, 2, 1)).reshape(B, C, H, W)


# ----------------------------------------------------------------------------- reference
def se_layer_ref(x, fc1_weight, fc2_weight):
    """Pure-JAX reference matching the PyTorch SELayer forward."""
    xf = x.astype(jnp.float32)
    y = jnp.mean(xf, axis=(2, 3))                                              # (B, C)
    y = jnp.maximum(
        jnp.einsum("bc,rc->br", y, fc1_weight.astype(jnp.float32),
                   precision=jax.lax.Precision.HIGHEST), 0.0)                  # (B, Cr)
    y = jax.nn.sigmoid(
        jnp.einsum("br,cr->bc", y, fc2_weight.astype(jnp.float32),
                   precision=jax.lax.Precision.HIGHEST))                       # (B, C)
    return (xf * y[:, :, None, None]).astype(x.dtype)


if __name__ == "__main__":
    reduction = 16

    # --- Test 1: spatial-on-lanes path (HW = 256 lane-dense), f32 activations.
    B, C, H, W = 2, 64, 16, 16
    Cr = C // reduction
    kx, k1, k2 = jax.random.split(jax.random.PRNGKey(0), 3)
    x = jax.random.normal(kx, (B, C, H, W), dtype=jnp.float32)
    # Bias-free Linear weights, PyTorch layout: fc1.weight (Cr, C), fc2.weight (C, Cr).
    fc1_w = jax.random.normal(k1, (Cr, C), dtype=jnp.float32) * (1.0 / C) ** 0.5
    fc2_w = jax.random.normal(k2, (C, Cr), dtype=jnp.float32) * (1.0 / Cr) ** 0.5

    out = jax.block_until_ready(se_layer(x, fc1_w, fc2_w))
    ref = se_layer_ref(x, fc1_w, fc2_w)
    assert out.shape == x.shape
    assert jnp.allclose(out, ref, atol=1e-4, rtol=1e-4), "CHW path mismatch vs reference"

    # --- Test 2: channels-on-lanes path (7x7 spatial, C = 128), bf16 activations.
    B2, C2, H2, W2 = 2, 128, 7, 7
    Cr2 = C2 // reduction
    kx2, k12, k22 = jax.random.split(jax.random.PRNGKey(1), 3)
    x2 = jax.random.normal(kx2, (B2, C2, H2, W2), dtype=jnp.float32).astype(jnp.bfloat16)
    fc1_w2 = (jax.random.normal(k12, (Cr2, C2), dtype=jnp.float32)
              * (1.0 / C2) ** 0.5).astype(jnp.bfloat16)
    fc2_w2 = (jax.random.normal(k22, (C2, Cr2), dtype=jnp.float32)
              * (1.0 / Cr2) ** 0.5).astype(jnp.bfloat16)

    out2 = jax.block_until_ready(se_layer(x2, fc1_w2, fc2_w2))
    ref2 = se_layer_ref(x2, fc1_w2, fc2_w2)
    assert out2.shape == x2.shape
    assert jnp.allclose(out2.astype(jnp.float32), ref2.astype(jnp.float32),
                        atol=5e-2, rtol=5e-2), "HWC path mismatch vs reference"

    print("KERNEL_OK")
</pallas_src>

<mosaic_0001>
module attributes {stable_mosaic.version = 11 : i64} {
  func.func @_se_kernel_chw(%arg0: i32, %arg1: memref<1x64x256xf32, #tpu.memory_space<vmem>>, %arg2: memref<64x4xf32, #tpu.memory_space<vmem>>, %arg3: memref<64x4xf32, #tpu.memory_space<vmem>>, %arg4: memref<1x64x256xf32, #tpu.memory_space<vmem>>) attributes {dimension_semantics = [#tpu.dimension_semantics<parallel>], iteration_bounds = array<i64: 2>, scalar_prefetch = 0 : i64, scratch_operands = 0 : i64, tpu.core_type = #tpu.core_type<tc>, window_params = [{transform_indices = @transform_0, window_bounds = array<i64: 1, 64, 256>}, {pipeline_mode = #tpu.pipeline_mode<synchronous>, transform_indices = @transform_1, window_bounds = array<i64: 64, 4>}, {pipeline_mode = #tpu.pipeline_mode<synchronous>, transform_indices = @transform_2, window_bounds = array<i64: 64, 4>}, {transform_indices = @transform_3, window_bounds = array<i64: 1, 64, 256>}]} {
    %c0 = arith.constant 0 : index
    %c0_0 = arith.constant 0 : index
    %c0_1 = arith.constant 0 : index
    %0 = vector.load %arg1[%c0, %c0_0, %c0_1] : memref<1x64x256xf32, #tpu.memory_space<vmem>>, vector<1x64x256xf32>
    %1 = vector.shape_cast %0 : vector<1x64x256xf32> to vector<64x256xf32>
    %cst = arith.constant dense<0.000000e+00> : vector<64xf32>
    %2 = vector.multi_reduction <add>, %1, %cst [1] : vector<64x256xf32> to vector<64xf32>
    %3 = vector.shape_cast %2 : vector<64xf32> to vector<64x1xf32>
    %cst_2 = arith.constant 2.560000e+02 : f32
    %4 = vector.broadcast %cst_2 : f32 to vector<64x1xf32>
    %5 = arith.divf %3, %4 : vector<64x1xf32>
    %c0_3 = arith.constant 0 : index
    %c0_4 = arith.constant 0 : index
    %6 = vector.load %arg2[%c0_3, %c0_4] : memref<64x4xf32, #tpu.memory_space<vmem>>, vector<64x4xf32>
    %7 = vector.broadcast %5 : vector<64x1xf32> to vector<64x4xf32>
    %8 = arith.mulf %6, %7 : vector<64x4xf32>
    %cst_5 = arith.constant dense<0.000000e+00> : vector<4xf32>
    %9 = vector.multi_reduction <add>, %8, %cst_5 [0] : vector<64x4xf32> to vector<4xf32>
    %10 = vector.shape_cast %9 : vector<4xf32> to vector<1x4xf32>
    %cst_6 = arith.constant 0.000000e+00 : f32
    %11 = vector.broadcast %cst_6 : f32 to vector<1x4xf32>
    %12 = arith.maximumf %10, %11 : vector<1x4xf32>
    %c0_7 = arith.constant 0 : index
    %c0_8 = arith.constant 0 : index
    %13 = vector.load %arg3[%c0_7, %c0_8] : memref<64x4xf32, #tpu.memory_space<vmem>>, vector<64x4xf32>
    %14 = vector.broadcast %12 : vector<1x4xf32> to vector<64x4xf32>
    %15 = arith.mulf %13, %14 : vector<64x4xf32>
    %cst_9 = arith.constant dense<0.000000e+00> : vector<64xf32>
    %16 = vector.multi_reduction <add>, %15, %cst_9 [1] : vector<64x4xf32> to vector<64xf32>
    %17 = vector.shape_cast %16 : vector<64xf32> to vector<64x1xf32>
    %cst_10 = arith.constant 0.000000e+00 : f32
    %18 = vector.broadcast %cst_10 : f32 to vector<64x1xf32>
    %19 = arith.subf %18, %17 : vector<64x1xf32>
    %20 = math.exp %19 : vector<64x1xf32>
    %cst_11 = arith.constant 1.000000e+00 : f32
    %21 = vector.broadcast %cst_11 : f32 to vector<64x1xf32>
    %22 = arith.addf %21, %20 : vector<64x1xf32>
    %cst_12 = arith.constant 1.000000e+00 : f32
    %23 = vector.broadcast %cst_12 : f32 to vector<64x1xf32>
    %24 = arith.divf %23, %22 : vector<64x1xf32>
    %25 = vector.broadcast %24 : vector<64x1xf32> to vector<64x256xf32>
    %26 = arith.mulf %1, %25 : vector<64x256xf32>
    %c0_13 = arith.constant 0 : index
    %c0_14 = arith.constant 0 : index
    %c0_15 = arith.constant 0 : index
    %27 = vector.load %arg4[%c0_13, %c0_14, %c0_15] : memref<1x64x256xf32, #tpu.memory_space<vmem>>, vector<1x64x256xf32>
    %28 = vector.shape_cast %27 : vector<1x64x256xf32> to vector<64x256xf32>
    %29 = vector.shape_cast %26 : vector<64x256xf32> to vector<1x64x256xf32>
    tpu.vector_store %arg4[%c0_13, %c0_14, %c0_15], %29 {strides = array<i32>} : memref<1x64x256xf32, #tpu.memory_space<vmem>>, vector<1x64x256xf32>,
    return
  }
  func.func @transform_0(%arg0: i32) -> (i32, i32, i32) {
    %c0_i32 = arith.constant 0 : i32
    %c0_i32_0 = arith.constant 0 : i32
    %c0_i32_1 = arith.constant 0 : i32
    return %arg0, %c0_i32, %c0_i32_0 : i32, i32, i32
  }
  func.func @transform_1(%arg0: i32) -> (i32, i32) {
    %c0_i32 = arith.constant 0 : i32
    %c0_i32_0 = arith.constant 0 : i32
    %c0_i32_1 = arith.constant 0 : i32
    return %c0_i32, %c0_i32_0 : i32, i32
  }
  func.func @transform_2(%arg0: i32) -> (i32, i32) {
    %c0_i32 = arith.constant 0 : i32
    %c0_i32_0 = arith.constant 0 : i32
    %c0_i32_1 = arith.constant 0 : i32
    return %c0_i32, %c0_i32_0 : i32, i32
  }
  func.func @transform_3(%arg0: i32) -> (i32, i32, i32) {
    %c0_i32 = arith.constant 0 : i32
    %c0_i32_0 = arith.constant 0 : i32
    %c0_i32_1 = arith.constant 0 : i32
    return %arg0, %c0_i32, %c0_i32_0 : i32, i32, i32
  }
}

</mosaic_0001>

<bundles_post_ra>
// kernel: tpu_custom_call.1
= control target key start
LH: loop header
LB: loop body
LE: loop exit
PB: predicated region body
PF: predicated region fallthrough
CT: control target
= control target key end

     0   :  { %8 = vsyncpa [#allocation3], 0  ;;  %s1007_s0 = inlined_call_operand.hbm [shape: f32[2,64,256], index: 0, kind: input, shape index: {}]   ;;  %s1008_s1 = inlined_call_operand.vmem [shape: f32[64,4], index: 1, kind: input, shape index: {}]   ;;  %s1009_s2 = inlined_call_operand.vmem [shape: f32[64,4], index: 2, kind: input, shape index: {}]   ;;  %s1010_s3 = inlined_call_operand.hbm [shape: f32[2,64,256], index: 3, kind: output, shape index: {}]  }
   0x1   :  { %10 = vsyncpa [#allocation3 + $0x1], 0 }
   0x2   :  { %11 = vsyncpa [#allocation4], 0 }
   0x3   :  { %13 = vsyncpa [#allocation4 + $0x1], 0  ;;  %s702_s12 = smov 0   ;;  %s704_s13 = smov 0  }
   0x4   :  { %s706_s14 = smov 0   ;;  %s708_s15 = smov 0  }
   0x5 LB: > { %s723_s16 = sadd.s32 4294967295, %s674_s15   ;;  %s484_s17 = sadd.s32 4294967294, %s674_s15   ;;  %s674_s15 = sphi %s708_s15, %s1025_s15   ;;  %s670_s14 = sphi %s706_s14, %s1024_s14   ;;  %s666_s13 = sphi %s704_s13, %s1023_s13   ;;  %s662_s12 = sphi %s702_s12, %s1022_s12  }
   0x6   : > { %s727_s18 = sadd.s32 1, %s674_s15   ;;  %s26_s19 = sadd.s32 1, %s670_s14 }
   0x7   : > { %s23_s20 = ssub.s32 %s674_s15, %s727_s18  ;;  %p33_p0 = scmp.ne.s32.totalorder %s670_s14, %s666_s13 }
   0x8   : > { %p24_p1 = scmp.eq.s32.totalorder %s23_s20, 0  ;;  %p34_p2 = scmp.eq.s32.totalorder %s674_s15, 0 }
   0x9   : > { %p39_p3 = scmp.ne.s32.totalorder %s666_s13, %s662_s12  ;;  %p40_p4 = scmp.eq.s32.totalorder %s723_s16, 0 }
   0xa   : > { %s739_s21 = scalar_select %p24_p1, %s670_s14, %s26_s19  }
   0xb   : > { %p741_p5 = por %p34_p2, %p33_p0  ;;  %p745_p6 = por %p40_p4, %p39_p3 }
   0xc   : > { %p105_p7 = scmp.eq.s32.totalorder %s723_s16, 1  ;;  %p111_p8 = scmp.eq.s32.totalorder %s484_s17, 1 }
   0xd   : > { %s1014_s23 = scalar_select %p745_p6, 1, 0 }
   0xe   : > { %p512_p10 = scmp.lt.s32.totalorder %s674_s15, 2  ;;  %p752_p11 = por %p105_p7, %p33_p0 }
   0xf   : > { %p756_p12 = por %p111_p8, %p39_p3  ;;  %s137_s26 = sand.u32 1, %s670_s14  }
  0x10   : > { %s1015_s24 = scalar_select %p752_p11, 1, 0 }
  0x11   : > { %s1016_s25 = scalar_select %p756_p12, 1, 0 }
  0x12   : > { %s498_s27 = sshll.u32 %s674_s15, 11  ;;  %s487_s28 = sshll.u32 %s137_s26, 7 }
  0x13   : > { %s765_s4 = scalar_lea.hbm %s1007_s0, %s498_s27  ;;  %s141_s5 = scalar_lea.vmem [#allocation2], %s487_s28 }
  0x14   : > { %s148_s6 = sshll.u32 %s141_s5, 4  ;;  %p769_p13 = pnand %p512_p10, %p741_p5  ;;  %s773_s6 = int_to_ptr.vmem [resolvable:$true] %s148_s6 }
  0x15   : > { %s775_s8 = scalar_lea.sflag [#allocation3], %s137_s26  ;;  %s582_s9 = scalar_lea.hbm %s765_s4, 2048 }
  0x16   : > { %p583_p0 = scmp.ne.s32.totalorder %s765_s4, %s582_s9  ;;  %p584_p1 = pneg %p769_p13 }
  0x17   : > { %s587_s17 = scalar_lea.hbm %s1007_s0, 4096  ;;  %p588_p4 = scmp.lt.s32.totalorder %s765_s4, %s1007_s0 }
  0x18   : > { %p585_p2 = pnand %p584_p1, %p583_p0  ;;  %p589_p5 = scmp.lt.s32.totalorder %s587_s17, %s582_s9 }
  0x1a   : > { %p586_p3 = pneg %p585_p2  ;;  %p590_p7 = por %p589_p5, %p588_p4 }
  0x1c   : > { %p591_p8 = pnand %p590_p7, %p586_p3 }
  0x1e   : > { %594 = shalt.err (!%p591_p8)
}
  0x1f   : > { %s595_s22 = scalar_lea.vmem %s773_s6, 2048  ;;  %s676_s26 = smov [#allocation2]  }
  0x20   : > { %p596_p10 = scmp.ne.s32.totalorder %s773_s6, %s595_s22  ;;  %s600_s27 = sshll.u32 %s676_s26, 4  ;;  %s601_s27 = int_to_ptr.vmem [resolvable:$false] %s600_s27 }
  0x21   : > { %s602_s28 = scalar_lea.vmem %s601_s27, 4096  ;;  %p603_p2 = scmp.lt.s32.totalorder %s773_s6, %s601_s27 }
  0x22   : > { %p598_p9 = pnand %p596_p10, %p584_p1  ;;  %p604_p12 = scmp.lt.s32.totalorder %s602_s28, %s595_s22 }
  0x24   : > { %p599_p0 = pneg %p598_p9  ;;  %p605_p11 = por %p604_p12, %p603_p2 }
  0x26   : > { %p606_p6 = pnand %p605_p11, %p599_p0 }
  0x28   : > { %609 = shalt.err (!%p606_p6)
}
  0x29   : > { %s677_s29 = smov 256   ;;  %s678_s30 = smov 16  }
  0x2a   : > { %507 = dma.hbm_to_vmem [thread:$0]  (!%p769_p13), %s765_s4, 2048, %s773_s6, %s775_s8, %s677_s29, %s677_s29, %s678_s30  }
  0x2b   : > { %p490_p9 = scmp.ge.s32.totalorder %s674_s15, 1  ;;  %p156_p1 = scmp.lt.s32.totalorder %s674_s15, 3 }
  0x2d   : > { %p157_p3 = pnand %p490_p9, %p156_p1 }
  0x2e   : > { %s799_s5 = sand.u32 (!%p157_p3), 1, %s666_s13   ;;  %p1018_p6 = scmp.ne.s32.totalorder (!%p157_p3), %s1014_s23, 0 }
  0x2f   : > { %160 = sbr.rel (%p157_p3) target bundleno = 435 (0x1b3), region = 32  ;;  %s491_s9 = sshll.u32 (!%p157_p3), %s799_s5, 7 }
  0x30   : > { %s163_s10 = scalar_lea.sflag (!%p157_p3), [#allocation3], %s799_s5  ;;  %s166_s11 = scalar_lea.vmem (!%p157_p3), [#allocation2], %s491_s9 }
  0x34   : > { %653 = dma.done.wait (%p1018_p6), %s163_s10, 2048  }
  0x35   : > { %655 = vsyncadd (%p1018_p6), %s163_s10, 4294965248  ;;  %v809_v0 = vld [vmem:[%s166_s11] sm:$0xff]  ;;  %v811_v1 = vld [vmem:[%s166_s11 + $0x8] sm:$0xff]  ;;  %vm254_vm0 = vcmask 31744   ;;  %s927_s23 = scalar_lea.vmem [#allocation5], %s491_s9  ;;  %s499_s9 = sshll.u32 %s723_s16, 11 }
  0x36   : > { %v813_v2 = vld [vmem:[%s166_s11 + $0x20] sm:$0xff]  ;;  %v205_v3 = vadd.f32 %v811_v1, %v809_v0  ;;  %v817_v4 = vld [vmem:[%s166_s11 + $0x28] sm:$0xff]  ;;  %v819_v5 = vld [vmem:[%s166_s11 + $0x10] sm:$0xff]  ;;  %s411_s4 = sshll.u32 %s927_s23, 4  ;;  %s956_s8 = scalar_lea.hbm %s1010_s3, %s499_s9  ;;  %s958_s4 = int_to_ptr.vmem [resolvable:$true] %s411_s4 }
  0x37   : > { %v821_v6 = vld [vmem:[%s166_s11 + $0x18] sm:$0xff]  ;;  %v211_v7 = vadd.f32 %v817_v4, %v813_v2  ;;  %v825_v8 = vld [vmem:[%s166_s11 + $0x30] sm:$0xff]  ;;  %v833_v12 = vld [vmem:[%s166_s11 + $0x40] sm:$0xff]  ;;  %s398_s16 = scalar_lea.sflag [#allocation4], %s799_s5  ;;  %s610_s17 = scalar_lea.vmem %s958_s4, 2048 }
  0x38   : > { %v827_v9 = vld [vmem:[%s166_s11 + $0x38] sm:$0xff]  ;;  %206 = vadd.xlane.f32.xlu0 %v205_v3  ;;  %v208_v10 = vadd.f32 %v821_v6, %v819_v5  ;;  %v835_v13 = vld [vmem:[%s166_s11 + $0x48] sm:$0xff]  ;;  %v837_v14 = vld [vmem:[%s166_s11 + $0x50] sm:$0xff]  ;;  %p611_p11 = scmp.ne.s32.totalorder %s958_s4, %s610_s17  ;;  %p1019_p12 = scmp.ne.s32.totalorder %s1015_s24, 0 }
  0x39   : > { %212 = vadd.xlane.f32.xlu1 %v211_v7  ;;  %v214_v11 = vadd.f32 %v827_v9, %v825_v8  ;;  %v839_v15 = vld [vmem:[%s166_s11 + $0x58] sm:$0xff]  ;;  %v217_v16 = vadd.f32 %v835_v13, %v833_v12  ;;  %v845_v18 = vld [vmem:[%s166_s11 + $0x60] sm:$0xff]  ;;  %v847_v19 = vld [vmem:[%s166_s11 + $0x68] sm:$0xff]  ;;  %s679_s19 = smov [#allocation5]  }
  0x3a   : > { %v220_v17 = vadd.f32 %v839_v15, %v837_v14  ;;  %v849_v20 = vld [vmem:[%s166_s11 + $0x70] sm:$0xff]  ;;  %v851_v21 = vld [vmem:[%s166_s11 + $0x78] sm:$0xff]  ;;  %v223_v22 = vadd.f32 %v847_v19, %v845_v18  ;;  %v238_v27 = vld [vmem:[%s1008_s1] sm:$0xff]  ;;  %p612_p13 = pnand %p611_p11, %p1019_p12  ;;  %s614_s20 = sshll.u32 %s679_s19, 4  ;;  %s615_s20 = int_to_ptr.vmem [resolvable:$false] %s614_s20 }
  0x3b   : > { %v226_v23 = vadd.f32 %v851_v21, %v849_v20  ;;  %v240_v29 = vld [vmem:[%s1008_s1 + $0x10] sm:$0xff]  ;;  %v239_v30 = vld [vmem:[%s1008_s1 + $0x8] sm:$0xff]  ;;  %v241_v34 = vld [vmem:[%s1008_s1 + $0x18] sm:$0xff]  ;;  %s616_s22 = scalar_lea.vmem %s615_s20, 4096  ;;  %p617_p5 = scmp.lt.s32.totalorder %s958_s4, %s615_s20 }
  0x3c   : > { %209 = vadd.xlane.f32.xlu0 %v208_v10  ;;  %v242_v40 = vld [vmem:[%s1008_s1 + $0x20] sm:$0xff]  ;;  %v243_v45 = vld [vmem:[%s1008_s1 + $0x28] sm:$0xff]  ;;  %v244_v54 = vld [vmem:[%s1008_s1 + $0x30] sm:$0xff]  ;;  %p613_p4 = pneg %p612_p13  ;;  %p618_p7 = scmp.lt.s32.totalorder %s616_s22, %s610_s17 }
  0x3d   : > { %215 = vadd.xlane.f32.xlu1 %v214_v11  ;;  %v245_v58 = vld [vmem:[%s1008_s1 + $0x38] sm:$0xff] }
  0x3e   : > { %p619_p8 = por %p618_p7, %p617_p5 }
  0x40   : > { %218 = vadd.xlane.f32.xlu0 %v217_v16  ;;  %p620_p10 = pnand %p619_p8, %p613_p4 }
  0x41   : > { %221 = vadd.xlane.f32.xlu1 %v220_v17 }
  0x44   : > { %224 = vadd.xlane.f32.xlu0 %v223_v22 }
  0x45   : > { %227 = vadd.xlane.f32.xlu1 %v226_v23 }
  0xc1   : > { %v207_v24 = vpop.xlane.xlu0 %206 }
  0xc2   : > { %v230_v25 = vmul.f32 0.00390625, %v207_v24  ;;  %v213_v26 = vpop.xlane.xlu1 %212 }
  0xc3   : > { %v232_v28 = vmul.f32 0.00390625, %v213_v26 }
  0xc4   : > { %v246_v32 = vmul.f32 %v238_v27, %v230_v25 }
  0xc5   : > { %v210_v31 = vpop.xlane.xlu0 %209  ;;  %v248_v37 = vmul.f32 %v240_v29, %v232_v28  ;;  %v278_v29 = vld [vmem:[%s1009_s2 + $0x8] sm:$0xff] }
  0xc6   : > { %v231_v33 = vmul.f32 0.00390625, %v210_v31  ;;  %v216_v35 = vpop.xlane.xlu1 %215  ;;  %v255_v42 = vsel %vm254_vm0, %v246_v32, 0.0  ;;  %v280_v32 = vld [vmem:[%s1009_s2 + $0x18] sm:$0xff] }
  0xc7   : > { %v233_v36 = vmul.f32 0.00390625, %v216_v35  ;;  %v258_v49 = vsel %vm254_vm0, %v248_v37, 0.0 }
  0xc8   : > { %v247_v38 = vmul.f32 %v239_v30, %v231_v33  ;;  %v277_v30 = vld [vmem:[%s1009_s2] sm:$0xff]  ;;  %v279_v33 = vld [vmem:[%s1009_s2 + $0x10] sm:$0xff] }
  0xc9   : > { %v249_v39 = vmul.f32 %v241_v34, %v233_v36  ;;  %v219_v41 = vpop.xlane.xlu0 %218 }
  0xca   : > { %v256_v43 = vsel %vm254_vm0, %v247_v38, 0.0  ;;  %v234_v44 = vmul.f32 0.00390625, %v219_v41  ;;  %v222_v46 = vpop.xlane.xlu1 %221  ;;  %v281_v41 = vld [vmem:[%s1009_s2 + $0x20] sm:$0xff] }
  0xcb   : > { %v257_v47 = vadd.f32 %v256_v43, %v255_v42  ;;  %v235_v48 = vmul.f32 0.00390625, %v222_v46  ;;  %v260_v50 = vsel %vm254_vm0, %v249_v39, 0.0  ;;  %v284_v46 = vld [vmem:[%s1009_s2 + $0x38] sm:$0xff] }
  0xcc   : > { %v250_v51 = vmul.f32 %v242_v40, %v234_v44  ;;  %v282_v40 = vld [vmem:[%s1009_s2 + $0x28] sm:$0xff] }
  0xcd   : > { %v259_v52 = vadd.f32 %v258_v49, %v257_v47  ;;  %v251_v53 = vmul.f32 %v243_v45, %v235_v48  ;;  %v225_v55 = vpop.xlane.xlu0 %224  ;;  %v283_v47 = vld [vmem:[%s1009_s2 + $0x30] sm:$0xff] }
  0xce   : > { %v262_v56 = vsel %vm254_vm0, %v250_v51, 0.0  ;;  %v236_v57 = vmul.f32 0.00390625, %v225_v55  ;;  %v228_v59 = vpop.xlane.xlu1 %227 }
  0xcf   : > { %v261_v60 = vadd.f32 %v260_v50, %v259_v52  ;;  %v237_v61 = vmul.f32 0.00390625, %v228_v59  ;;  %v264_v62 = vsel %vm254_vm0, %v251_v53, 0.0 }
  0xd0   : > { %v252_v63 = vmul.f32 %v244_v54, %v236_v57 }
  0xd1   : > { %v263_v3 = vadd.f32 %v262_v56, %v261_v60  ;;  %v253_v7 = vmul.f32 %v245_v58, %v237_v61 }
  0xd2   : > { %v266_v10 = vsel %vm254_vm0, %v252_v63, 0.0 }
  0xd3   : > { %v265_v11 = vadd.f32 %v264_v62, %v263_v3  ;;  %v268_v16 = vsel %vm254_vm0, %v253_v7, 0.0 }
  0xd5   : > { %v267_v17 = vadd.f32 %v266_v10, %v265_v11 }
  0xd7   : > { %v269_v22 = vadd.f32 %v268_v16, %v267_v17 }
  0xd9   : > { %v270_v23 = vrot.slane %v269_v22, 4 }
  0xdb   : > { %v271_v24 = vadd.f32 %v270_v23, %v269_v22 }
  0xdd   : > { %v272_v25 = vrot.slane %v271_v24, 2 }
  0xdf   : > { %v273_v26 = vadd.f32 %v272_v25, %v271_v24 }
  0xe1   : > { %v274_v27 = vrot.slane %v273_v26, 1 }
  0xe3   : > { %v275_v28 = vadd.f32 %v274_v27, %v273_v26 }
  0xe5   : > { %v276_v31 = vmax.f32 %v275_v28, 0.0 }
  0xe7   : > { %v286_v34 = vmul.f32 %v278_v29, %v276_v31  ;;  %v285_v35 = vmul.f32 %v277_v30, %v276_v31  ;;  %v288_v38 = vmul.f32 %v280_v32, %v276_v31  ;;  %v287_v39 = vmul.f32 %v279_v33, %v276_v31 }
  0xe8   : > { %v290_v44 = vmul.f32 %v282_v40, %v276_v31  ;;  %v289_v45 = vmul.f32 %v281_v41, %v276_v31  ;;  %v292_v50 = vmul.f32 %v284_v46, %v276_v31  ;;  %v291_v51 = vmul.f32 %v283_v47, %v276_v31 }
  0xe9   : > { %v296_v36 = vsel %vm254_vm0, %v286_v34, 0.0  ;;  %v293_v37 = vsel %vm254_vm0, %v285_v35, 0.0  ;;  %v302_v42 = vsel %vm254_vm0, %v288_v38, 0.0  ;;  %v299_v43 = vsel %vm254_vm0, %v287_v39, 0.0 }
  0xea   : > { %297 = vadd.xlane.f32.xlu1 %v296_v36  ;;  %294 = vadd.xlane.f32.xlu0 %v293_v37  ;;  %v308_v48 = vsel %vm254_vm0, %v290_v44, 0.0  ;;  %v305_v49 = vsel %vm254_vm0, %v289_v45, 0.0  ;;  %v314_v52 = vsel %vm254_vm0, %v292_v50, 0.0  ;;  %v311_v53 = vsel %vm254_vm0, %v291_v51, 0.0 }
  0xee   : > { %303 = vadd.xlane.f32.xlu1 %v302_v42  ;;  %300 = vadd.xlane.f32.xlu0 %v299_v43 }
  0xf2   : > { %309 = vadd.xlane.f32.xlu1 %v308_v48  ;;  %306 = vadd.xlane.f32.xlu0 %v305_v49 }
  0xf6   : > { %315 = vadd.xlane.f32.xlu1 %v314_v52  ;;  %312 = vadd.xlane.f32.xlu0 %v311_v53 }
 0x173   : > { %v298_v54 = vpop.xlane.xlu1 %297  ;;  %v295_v55 = vpop.xlane.xlu0 %294 }
 0x174   : > { %v318_v56 = vsub.f32 0.0, %v298_v54  ;;  %v317_v57 = vsub.f32 0.0, %v295_v55 }
 0x176   : > { %v327_v58 = vmul.f32 1.442695, %v318_v56  ;;  %v325_v59 = vmul.f32 1.442695, %v317_v57 }
 0x177   : > { %v304_v60 = vpop.xlane.xlu1 %303  ;;  %v301_v61 = vpop.xlane.xlu0 %300 }
 0x178   : > { %550 = vpow2.f32 %v327_v58  ;;  %v320_v62 = vsub.f32 0.0, %v304_v60  ;;  %v319_v63 = vsub.f32 0.0, %v301_v61 }
 0x179   : > { %552 = vpow2.f32 %v325_v59 }
 0x17a   : > { %v331_v3 = vmul.f32 1.442695, %v320_v62  ;;  %v329_v7 = vmul.f32 1.442695, %v319_v63 }
 0x17b   : > { %v310_v10 = vpop.xlane.xlu1 %309  ;;  %v307_v11 = vpop.xlane.xlu0 %306 }
 0x17c   : > { %554 = vpow2.f32 %v331_v3  ;;  %v322_v16 = vsub.f32 0.0, %v310_v10  ;;  %v321_v17 = vsub.f32 0.0, %v307_v11 }
 0x17d   : > { %556 = vpow2.f32 %v329_v7 }
 0x17e   : > { %v335_v22 = vmul.f32 1.442695, %v322_v16  ;;  %v333_v23 = vmul.f32 1.442695, %v321_v17 }
 0x17f   : > { %v316_v24 = vpop.xlane.xlu1 %315  ;;  %v313_v25 = vpop.xlane.xlu0 %312 }
 0x180   : > { %558 = vpow2.f32 %v335_v22  ;;  %v324_v26 = vsub.f32 0.0, %v316_v24  ;;  %v323_v27 = vsub.f32 0.0, %v313_v25 }
 0x181   : > { %560 = vpow2.f32 %v333_v23 }
 0x182   : > { %v339_v28 = vmul.f32 1.442695, %v324_v26  ;;  %v337_v29 = vmul.f32 1.442695, %v323_v27 }
 0x184   : > { %562 = vpow2.f32 %v339_v28 }
 0x185   : > { %v551_v30 = vpop.eup %550  ;;  %564 = vpow2.f32 %v337_v29 }
 0x186   : > { %v553_v31 = vpop.eup %552  ;;  %v342_v32 = vadd.f32 1.0, %v551_v30 }
 0x187   : > { %v341_v33 = vadd.f32 1.0, %v553_v31 }
 0x188   : > { %566 = vrcp.f32 %v342_v32 }
 0x189   : > { %v555_v34 = vpop.eup %554  ;;  %568 = vrcp.f32 %v341_v33 }
 0x18a   : > { %v557_v35 = vpop.eup %556  ;;  %v344_v36 = vadd.f32 1.0, %v555_v34 }
 0x18b   : > { %v343_v37 = vadd.f32 1.0, %v557_v35 }
 0x18c   : > { %570 = vrcp.f32 %v344_v36 }
 0x18d   : > { %v559_v38 = vpop.eup %558  ;;  %572 = vrcp.f32 %v343_v37 }
 0x18e   : > { %v561_v39 = vpop.eup %560  ;;  %v346_v40 = vadd.f32 1.0, %v559_v38 }
 0x18f   : > { %v345_v41 = vadd.f32 1.0, %v561_v39 }
 0x190   : > { %574 = vrcp.f32 %v346_v40 }
 0x191   : > { %v563_v42 = vpop.eup %562  ;;  %576 = vrcp.f32 %v345_v41 }
 0x192   : > { %v565_v43 = vpop.eup %564  ;;  %v348_v44 = vadd.f32 1.0, %v563_v42 }
 0x193   : > { %v347_v45 = vadd.f32 1.0, %v565_v43 }
 0x194   : > { %578 = vrcp.f32 %v348_v44 }
 0x195   : > { %v567_v46 = vpop.eup %566  ;;  %580 = vrcp.f32 %v347_v45 }
 0x196   : > { %v569_v47 = vpop.eup %568  ;;  %v367_v48 = vmul.f32 %v567_v46, %v819_v5  ;;  %v368_v49 = vmul.f32 %v567_v46, %v821_v6 }
 0x197   : > { %v365_v50 = vmul.f32 %v569_v47, %v809_v0  ;;  %v366_v51 = vmul.f32 %v569_v47, %v811_v1 }
 0x198   : > { %383 = vst [vmem:[%s927_s23 + $0x10] sm:$0xff] %v367_v48  ;;  %384 = vst [vmem:[%s927_s23 + $0x18] sm:$0xff] %v368_v49 }
 0x199   : > { %v571_v5 = vpop.eup %570  ;;  %381 = vst [vmem:[%s927_s23] sm:$0xff] %v365_v50  ;;  %382 = vst [vmem:[%s927_s23 + $0x8] sm:$0xff] %v366_v51 }
 0x19a   : > { %v573_v0 = vpop.eup %572  ;;  %v371_v1 = vmul.f32 %v571_v5, %v825_v8  ;;  %v372_v6 = vmul.f32 %v571_v5, %v827_v9 }
 0x19b   : > { %v369_v52 = vmul.f32 %v573_v0, %v813_v2  ;;  %v370_v53 = vmul.f32 %v573_v0, %v817_v4 }
 0x19c   : > { %387 = vst [vmem:[%s927_s23 + $0x30] sm:$0xff] %v371_v1  ;;  %388 = vst [vmem:[%s927_s23 + $0x38] sm:$0xff] %v372_v6 }
 0x19d   : > { %v575_v54 = vpop.eup %574  ;;  %385 = vst [vmem:[%s927_s23 + $0x20] sm:$0xff] %v369_v52  ;;  %386 = vst [vmem:[%s927_s23 + $0x28] sm:$0xff] %v370_v53 }
 0x19e   : > { %v577_v55 = vpop.eup %576  ;;  %v375_v56 = vmul.f32 %v575_v54, %v837_v14  ;;  %v376_v8 = vmul.f32 %v575_v54, %v839_v15 }
 0x19f   : > { %v373_v57 = vmul.f32 %v577_v55, %v833_v12  ;;  %v374_v9 = vmul.f32 %v577_v55, %v835_v13 }
 0x1a0   : > { %391 = vst [vmem:[%s927_s23 + $0x50] sm:$0xff] %v375_v56  ;;  %392 = vst [vmem:[%s927_s23 + $0x58] sm:$0xff] %v376_v8 }
 0x1a1   : > { %v579_v2 = vpop.eup %578  ;;  %389 = vst [vmem:[%s927_s23 + $0x40] sm:$0xff] %v373_v57  ;;  %390 = vst [vmem:[%s927_s23 + $0x48] sm:$0xff] %v374_v9 }
 0x1a2   : > { %v581_v4 = vpop.eup %580  ;;  %v379_v14 = vmul.f32 %v579_v2, %v849_v20  ;;  %v380_v12 = vmul.f32 %v579_v2, %v851_v21 }
 0x1a3   : > { %v377_v13 = vmul.f32 %v581_v4, %v845_v18  ;;  %v378_v15 = vmul.f32 %v581_v4, %v847_v19 }
 0x1a4   : > { %395 = vst [vmem:[%s927_s23 + $0x70] sm:$0xff] %v379_v14  ;;  %396 = vst [vmem:[%s927_s23 + $0x78] sm:$0xff] %v380_v12 }
 0x1a5   : > { %393 = vst [vmem:[%s927_s23 + $0x60] sm:$0xff] %v377_v13  ;;  %394 = vst [vmem:[%s927_s23 + $0x68] sm:$0xff] %v378_v15 }
 0x1a6   : > { %623 = shalt.err (!%p620_p10)
}
 0x1a7   : > { %s624_s26 = scalar_lea.hbm %s956_s8, 2048  ;;  %s628_s29 = scalar_lea.hbm %s1010_s3, 4096 }
 0x1a8   : > { %p625_p0 = scmp.ne.s32.totalorder %s956_s8, %s624_s26  ;;  %p629_p1 = scmp.lt.s32.totalorder %s956_s8, %s1010_s3 }
 0x1a9   : > { %p630_p3 = scmp.lt.s32.totalorder %s628_s29, %s624_s26 }
 0x1aa   : > { %p626_p2 = pnand %p625_p0, %p1019_p12 }
 0x1ab   : > { %p631_p6 = por %p630_p3, %p629_p1 }
 0x1ac   : > { %p627_p9 = pneg %p626_p2 }
 0x1ae   : > { %p632_p11 = pnand %p631_p6, %p627_p9 }
 0x1b0   : > { %635 = shalt.err (!%p632_p11)
}
 0x1b1   : > { %s680_s11 = smov 256   ;;  %s681_s23 = smov 16  }
 0x1b2   : > { %502 = dma.vmem_to_hbm [thread:$0]  (%p1019_p12), %s958_s4, 2048, %s956_s8, %s398_s16, %s680_s11, %s680_s11, %s681_s23  }
 0x1b3 PF: > { %s426_s9 = sand.u32 1, %s662_s12   ;;  %p1020_p13 = scmp.ne.s32.totalorder %s1016_s25, 0 }
 0x1b4   : > { %p1021_p4 = scmp.ge.s32.totalorder %s674_s15, 2  ;;  %s427_s6 = scalar_lea.sflag [#allocation4], %s426_s9 }
 0x1b6   : > { %p509_p5 = pnand %p1021_p4, %p1020_p13 }
 0x1b8   : > { %p510_p7 = pneg %p509_p5 }
 0x1ba   : > { %657 = dma.done.wait (%p510_p7), %s427_s6, 2048  }
 0x1bb   : > { %659 = vsyncadd (%p510_p7), %s427_s6, 4294965248  ;;  %p16_p8 = scmp.ge.s32.totalorder %s727_s18, 4   ;;  %s1022_s12 = smov %s666_s13 }
 0x1bc   : > { %s1023_s13 = smov %s670_s14  ;;  %s1024_s14 = smov %s739_s21 }
 0x1bd   : > { %s1025_s15 = smov %s727_s18  ;;  %18 = sbr.rel (!%p16_p8) target bundleno = 5 (0x5), region = 77 }
 0x1c2   :  { %432 = vsyncpa [#allocation3], 1 }
 0x1c3   :  { %434 = vsyncpa [#allocation3 + $0x1], 1 }
 0x1c4   :  { %435 = vsyncpa [#allocation4], 1 }
 0x1c5   :  { %437 = vsyncpa [#allocation4 + $0x1], 1 }

</bundles_post_ra>
